<compile_context>
chip_gen: v5e
topology: v5e:2x2
jax: 0.10.0
libtpu: 0.0.40
codegen_flags: <defaults>
</compile_context>

<pallas_src>
import jax
import jax.numpy as jnp
from jax import lax
from jax.experimental import pallas as pl
from jax.experimental.pallas import tpu as pltpu


def _make_residual_block_kernel(C, H, W, OFF):
    """Fused conv3x3 -> PReLU -> conv3x3 -> +x over one image, im2col + MXU matmul."""
    HW = H * W

    def kernel(x_ref, w1_ref, b1_ref, alpha_ref, w2_ref, b2_ref, o_ref,
               buf_ref, im_ref):
        # x_ref    : (1, C, HW)            input block (one image), lane-dense
        # w*_ref   : (C, 9*C)  f32 VMEM    weight matrices (Cout x (tap, Cin))
        # b*_ref   : (C, 1)    f32 VMEM    biases
        # alpha_ref: (1,)      f32 SMEM    shared PReLU slope
        # o_ref    : (1, C, HW)
        # buf_ref  : (C, 2*OFF + HW) f32   row-padded flat line buffer (halo scratch)
        # im_ref   : (9*C, HW) f32         im2col tile (matmul RHS)

        xf = x_ref[0].astype(jnp.float32)                       # (C, HW)

        # ---- hoisted per-tap column-validity masks (rows handled by zero margins) ----
        pos = lax.broadcasted_iota(jnp.int32, (1, HW), 1)
        col = pos % W
        col_ok = {-1: col >= 1, 0: None, 1: col < (W - 1)}

        # ---- zero only the halo margins actually read (interior writes never dirty them) ----
        zero_margin = jnp.zeros((C, W + 1), jnp.float32)
        buf_ref[:, OFF - (W + 1):OFF] = zero_margin
        buf_ref[:, OFF + HW:OFF + HW + (W + 1)] = zero_margin

        def conv(src, w_ref, b_ref):
            # src (C, HW) f32 -> bias + 3x3 conv(src), one MXU matmul per conv.
            buf_ref[:, OFF:OFF + HW] = src            # one aligned whole-slab store
            t = 0
            for dy in (-1, 0, 1):
                for dx in (-1, 0, 1):
                    s = dy * W + dx
                    slab = buf_ref[:, OFF + s:OFF + s + HW]     # shifted tap (C, HW)
                    m = col_ok[dx]
                    if m is not None:
                        slab = jnp.where(m, slab, 0.0)          # kill lateral row-wrap
                    im_ref[t * C:(t + 1) * C, :] = slab
                    t += 1
            acc = jnp.dot(w_ref[...], im_ref[...],
                          preferred_element_type=jnp.float32)   # (C, HW) on the MXU
            return acc + b_ref[...]                             # (C,1) broadcast bias

        alpha = alpha_ref[0]

        r = conv(xf, w1_ref, b1_ref)                 # conv1
        r = jnp.where(r > 0, r, alpha * r)           # PReLU (shared alpha)
        r2 = conv(r, w2_ref, b2_ref)                 # conv2
        o_ref[0] = (xf + r2).astype(o_ref.dtype)     # residual add, single cast

    return kernel


def residual_block(x, w1, b1, alpha, w2, b2):
    """JAX/Pallas equivalent of ResidualBlock.forward.

    x     : (N, C, H, W)
    w1,w2 : (C, C, 3, 3)  (PyTorch OIHW conv weights)
    b1,b2 : (C,)
    alpha : (1,)          (PReLU weight, default init 0.25)
    """
    N, C, H, W = x.shape
    HW = H * W
    OFF = ((W + 1 + 127) // 128) * 128          # aligned interior offset in line buffer
    buf_cols = 2 * OFF + HW
    kernel = _make_residual_block_kernel(C, H, W, OFF)

    # Lane-dense I/O view (free reshape; NCHW is contiguous).
    x_r = x.reshape(N, C, HW)

    # OIHW -> (Cout, ky, kx, Cin) -> (Cout, 9*Cin); column order matches im2col rows t*C+ci.
    w1m = jnp.transpose(w1, (0, 2, 3, 1)).reshape(C, 9 * C).astype(jnp.float32)
    w2m = jnp.transpose(w2, (0, 2, 3, 1)).reshape(C, 9 * C).astype(jnp.float32)
    b1c = b1.reshape(C, 1).astype(jnp.float32)
    b2c = b2.reshape(C, 1).astype(jnp.float32)
    alpha1 = alpha.reshape(-1).astype(jnp.float32)

    # Explicit scoped-VMEM budget (defaults are 16/32 MiB; v7x physical is 64 MiB/TC).
    itemsize = x.dtype.itemsize
    est = (2 * 2 * C * HW * itemsize                 # double-buffered in/out blocks
           + (C * buf_cols + 9 * C * HW) * 4         # line buffer + im2col scratch
           + 2 * (9 * C * C + C) * 4                 # weights + biases
           + 6 * C * HW * 4)                         # f32 temporaries headroom
    vmem_limit = int(min(max(2 * est, 32 * 2 ** 20), 48 * 2 ** 20))

    out = pl.pallas_call(
        kernel,
        out_shape=jax.ShapeDtypeStruct((N, C, HW), x.dtype),
        grid_spec=pltpu.PrefetchScalarGridSpec(
            num_scalar_prefetch=0,
            grid=(N,),
            in_specs=[
                pl.BlockSpec((1, C, HW), lambda n: (n, 0, 0)),        # x
                pl.BlockSpec((C, 9 * C), lambda n: (0, 0)),           # w1 (VMEM, resident)
                pl.BlockSpec((C, 1), lambda n: (0, 0)),               # b1
                pl.BlockSpec(memory_space=pltpu.MemorySpace.SMEM),    # alpha (scalar)
                pl.BlockSpec((C, 9 * C), lambda n: (0, 0)),           # w2
                pl.BlockSpec((C, 1), lambda n: (0, 0)),               # b2
            ],
            out_specs=pl.BlockSpec((1, C, HW), lambda n: (n, 0, 0)),
            scratch_shapes=[
                pltpu.VMEM((C, buf_cols), jnp.float32),               # line buffer
                pltpu.VMEM((9 * C, HW), jnp.float32),                 # im2col tile
            ],
        ),
        compiler_params=pltpu.CompilerParams(
            dimension_semantics=("parallel",),
            vmem_limit_bytes=vmem_limit),
    )(x_r, w1m, b1c, alpha1, w2m, b2c)

    return out.reshape(N, C, H, W)


def _residual_block_ref(x, w1, b1, alpha, w2, b2):
    """Pure-JAX reference (lax conv) matching the PyTorch module."""
    def conv3x3(y, w, b):
        out = lax.conv_general_dilated(
            y, w, window_strides=(1, 1), padding=((1, 1), (1, 1)),
            dimension_numbers=("NCHW", "OIHW", "NCHW"))
        return out + b[None, :, None, None]

    r = conv3x3(x, w1, b1)
    a = alpha.reshape(())
    r = jnp.where(r > 0, r, a * r)          # PReLU
    r = conv3x3(r, w2, b2)
    return x + r


if __name__ == "__main__":
    key = jax.random.PRNGKey(0)
    kx, k1, k2, k3, k4 = jax.random.split(key, 5)

    N, C, H, W = 2, 4, 16, 16
    x = jax.random.normal(kx, (N, C, H, W), dtype=jnp.float32)

    # Deterministic "trained" parameters (values arbitrary; layout matches PyTorch).
    w1 = jax.random.normal(k1, (C, C, 3, 3), jnp.float32) * (1.0 / 6.0)
    b1 = jax.random.normal(k2, (C,), jnp.float32) * 0.1
    w2 = jax.random.normal(k3, (C, C, 3, 3), jnp.float32) * (1.0 / 6.0)
    b2 = jax.random.normal(k4, (C,), jnp.float32) * 0.1
    alpha = jnp.array([0.25], jnp.float32)   # nn.PReLU() default init

    out = residual_block(x, w1, b1, alpha, w2, b2)
    out = jax.block_until_ready(out)

    ref = _residual_block_ref(x, w1, b1, alpha, w2, b2)
    assert out.shape == (N, C, H, W)
    err = float(jnp.max(jnp.abs(out - ref)))
    # MXU f32 matmuls may execute as multi-pass reduced-precision on some TPU
    # generations, so allow a slightly looser tolerance than exact-f32 VPU math;
    # structural bugs (tap misalignment, bad masks) would produce O(0.1-1) errors.
    assert err < 2e-2, err
    print("KERNEL_OK")
</pallas_src>

<mosaic_0001>
module attributes {stable_mosaic.version = 11 : i64} {
  func.func @kernel(%arg0: i32, %arg1: memref<1x4x256xf32, #tpu.memory_space<vmem>>, %arg2: memref<4x36xf32, #tpu.memory_space<vmem>>, %arg3: memref<4x1xf32, #tpu.memory_space<vmem>>, %arg4: memref<1xf32, #tpu.memory_space<smem>>, %arg5: memref<4x36xf32, #tpu.memory_space<vmem>>, %arg6: memref<4x1xf32, #tpu.memory_space<vmem>>, %arg7: memref<1x4x256xf32, #tpu.memory_space<vmem>>, %arg8: memref<4x512xf32, #tpu.memory_space<vmem>>, %arg9: memref<36x256xf32, #tpu.memory_space<vmem>>) attributes {dimension_semantics = [#tpu.dimension_semantics<parallel>], iteration_bounds = array<i64: 2>, scalar_prefetch = 0 : i64, scratch_operands = 2 : i64, tpu.core_type = #tpu.core_type<tc>, window_params = [{transform_indices = @transform_0, window_bounds = array<i64: 1, 4, 256>}, {pipeline_mode = #tpu.pipeline_mode<synchronous>, transform_indices = @transform_1, window_bounds = array<i64: 4, 36>}, {pipeline_mode = #tpu.pipeline_mode<synchronous>, transform_indices = @transform_2, window_bounds = array<i64: 4, 1>}, {transform_indices = @transform_3, window_bounds = array<i64: 1>}, {pipeline_mode = #tpu.pipeline_mode<synchronous>, transform_indices = @transform_4, window_bounds = array<i64: 4, 36>}, {pipeline_mode = #tpu.pipeline_mode<synchronous>, transform_indices = @transform_5, window_bounds = array<i64: 4, 1>}, {transform_indices = @transform_6, window_bounds = array<i64: 1, 4, 256>}]} {
    %c0 = arith.constant 0 : index
    %c0_0 = arith.constant 0 : index
    %c0_1 = arith.constant 0 : index
    %0 = vector.load %arg1[%c0, %c0_0, %c0_1] : memref<1x4x256xf32, #tpu.memory_space<vmem>>, vector<1x4x256xf32>
    %1 = vector.shape_cast %0 : vector<1x4x256xf32> to vector<4x256xf32>
    %2 = tpu.iota {dimensions = array<i32: 1>} : vector<1x256xi32>
    %c16_i32 = arith.constant 16 : i32
    %c0_i32 = arith.constant 0 : i32
    %3 = arith.cmpi eq, %c16_i32, %c0_i32 : i32
    %c1_i32 = arith.constant 1 : i32
    %4 = arith.select %3, %c1_i32, %c16_i32 : i32
    %5 = vector.broadcast %4 : i32 to vector<1x256xi32>
    %6 = arith.remsi %2, %5 : vector<1x256xi32>
    %c0_i32_2 = arith.constant 0 : i32
    %7 = vector.broadcast %c0_i32_2 : i32 to vector<1x256xi32>
    %8 = arith.cmpi ne, %6, %7 : vector<1x256xi32>
    %c0_i32_3 = arith.constant 0 : i32
    %9 = vector.broadcast %c0_i32_3 : i32 to vector<1x256xi32>
    %10 = arith.cmpi slt, %6, %9 : vector<1x256xi32>
    %c0_i32_4 = arith.constant 0 : i32
    %11 = arith.cmpi slt, %4, %c0_i32_4 : i32
    %12 = vector.broadcast %11 : i1 to vector<1x256xi1>
    %13 = vector.broadcast %12 : vector<1x256xi1> to vector<1x256xi1>
    %14 = arith.xori %10, %13 : vector<1x256xi1>
    %15 = arith.andi %14, %8 : vector<1x256xi1>
    %16 = vector.broadcast %4 : i32 to vector<1x256xi32>
    %17 = arith.addi %6, %16 : vector<1x256xi32>
    %18 = arith.select %15, %17, %6 : vector<1x256xi1>, vector<1x256xi32>
    %c1_i32_5 = arith.constant 1 : i32
    %19 = vector.broadcast %c1_i32_5 : i32 to vector<1x256xi32>
    %20 = arith.cmpi sge, %18, %19 : vector<1x256xi32>
    %c15_i32 = arith.constant 15 : i32
    %21 = vector.broadcast %c15_i32 : i32 to vector<1x256xi32>
    %22 = arith.cmpi slt, %18, %21 : vector<1x256xi32>
    %cst = arith.constant 0.000000e+00 : f32
    %23 = vector.broadcast %cst : f32 to vector<4x17xf32>
    %c0_6 = arith.constant 0 : index
    %c111 = arith.constant 111 : index
    %24 = vector.load %arg8[%c0_6, %c111] : memref<4x512xf32, #tpu.memory_space<vmem>>, vector<4x17xf32>
    tpu.vector_store %arg8[%c0_6, %c111], %23 {strides = array<i32>} : memref<4x512xf32, #tpu.memory_space<vmem>>, vector<4x17xf32>,
    %c0_7 = arith.constant 0 : index
    %c384 = arith.constant 384 : index
    %25 = vector.load %arg8[%c0_7, %c384] : memref<4x512xf32, #tpu.memory_space<vmem>>, vector<4x17xf32>
    tpu.vector_store %arg8[%c0_7, %c384], %23 {strides = array<i32>} : memref<4x512xf32, #tpu.memory_space<vmem>>, vector<4x17xf32>,
    %c0_8 = arith.constant 0 : index
    %26 = memref.load %arg4[%c0_8] : memref<1xf32, #tpu.memory_space<smem>>
    %c0_9 = arith.constant 0 : index
    %c128 = arith.constant 128 : index
    %27 = vector.load %arg8[%c0_9, %c128] : memref<4x512xf32, #tpu.memory_space<vmem>>, vector<4x256xf32>
    tpu.vector_store %arg8[%c0_9, %c128], %1 {strides = array<i32>} : memref<4x512xf32, #tpu.memory_space<vmem>>, vector<4x256xf32>,
    %c0_10 = arith.constant 0 : index
    %c111_11 = arith.constant 111 : index
    %28 = vector.load %arg8[%c0_10, %c111_11] : memref<4x512xf32, #tpu.memory_space<vmem>>, vector<4x256xf32>
    %cst_12 = arith.constant 0.000000e+00 : f32
    %29 = vector.shape_cast %20 : vector<1x256xi1> to vector<1x256xi1>
    %30 = vector.broadcast %29 : vector<1x256xi1> to vector<4x256xi1>
    %31 = vector.broadcast %cst_12 : f32 to vector<4x256xf32>
    %32 = arith.select %30, %28, %31 : vector<4x256xi1>, vector<4x256xf32>
    %c0_13 = arith.constant 0 : index
    %c0_14 = arith.constant 0 : index
    %33 = vector.load %arg9[%c0_13, %c0_14] : memref<36x256xf32, #tpu.memory_space<vmem>>, vector<4x256xf32>
    tpu.vector_store %arg9[%c0_13, %c0_14], %32 {strides = array<i32>} : memref<36x256xf32, #tpu.memory_space<vmem>>, vector<4x256xf32>,
    %c0_15 = arith.constant 0 : index
    %c112 = arith.constant 112 : index
    %34 = vector.load %arg8[%c0_15, %c112] : memref<4x512xf32, #tpu.memory_space<vmem>>, vector<4x256xf32>
    %c4 = arith.constant 4 : index
    %c0_16 = arith.constant 0 : index
    %35 = vector.load %arg9[%c4, %c0_16] : memref<36x256xf32, #tpu.memory_space<vmem>>, vector<4x256xf32>
    tpu.vector_store %arg9[%c4, %c0_16], %34 {strides = array<i32>} : memref<36x256xf32, #tpu.memory_space<vmem>>, vector<4x256xf32>,
    %c0_17 = arith.constant 0 : index
    %c113 = arith.constant 113 : index
    %36 = vector.load %arg8[%c0_17, %c113] : memref<4x512xf32, #tpu.memory_space<vmem>>, vector<4x256xf32>
    %cst_18 = arith.constant 0.000000e+00 : f32
    %37 = vector.shape_cast %22 : vector<1x256xi1> to vector<1x256xi1>
    %38 = vector.broadcast %37 : vector<1x256xi1> to vector<4x256xi1>
    %39 = vector.broadcast %cst_18 : f32 to vector<4x256xf32>
    %40 = arith.select %38, %36, %39 : vector<4x256xi1>, vector<4x256xf32>
    %c8 = arith.constant 8 : index
    %c0_19 = arith.constant 0 : index
    %41 = vector.load %arg9[%c8, %c0_19] : memref<36x256xf32, #tpu.memory_space<vmem>>, vector<4x256xf32>
    tpu.vector_store %arg9[%c8, %c0_19], %40 {strides = array<i32>} : memref<36x256xf32, #tpu.memory_space<vmem>>, vector<4x256xf32>,
    %c0_20 = arith.constant 0 : index
    %c127 = arith.constant 127 : index
    %42 = vector.load %arg8[%c0_20, %c127] : memref<4x512xf32, #tpu.memory_space<vmem>>, vector<4x256xf32>
    %cst_21 = arith.constant 0.000000e+00 : f32
    %43 = vector.shape_cast %20 : vector<1x256xi1> to vector<1x256xi1>
    %44 = vector.broadcast %43 : vector<1x256xi1> to vector<4x256xi1>
    %45 = vector.broadcast %cst_21 : f32 to vector<4x256xf32>
    %46 = arith.select %44, %42, %45 : vector<4x256xi1>, vector<4x256xf32>
    %c12 = arith.constant 12 : index
    %c0_22 = arith.constant 0 : index
    %47 = vector.load %arg9[%c12, %c0_22] : memref<36x256xf32, #tpu.memory_space<vmem>>, vector<4x256xf32>
    tpu.vector_store %arg9[%c12, %c0_22], %46 {strides = array<i32>} : memref<36x256xf32, #tpu.memory_space<vmem>>, vector<4x256xf32>,
    %c0_23 = arith.constant 0 : index
    %c128_24 = arith.constant 128 : index
    %48 = vector.load %arg8[%c0_23, %c128_24] : memref<4x512xf32, #tpu.memory_space<vmem>>, vector<4x256xf32>
    %c16 = arith.constant 16 : index
    %c0_25 = arith.constant 0 : index
    %49 = vector.load %arg9[%c16, %c0_25] : memref<36x256xf32, #tpu.memory_space<vmem>>, vector<4x256xf32>
    tpu.vector_store %arg9[%c16, %c0_25], %48 {strides = array<i32>} : memref<36x256xf32, #tpu.memory_space<vmem>>, vector<4x256xf32>,
    %c0_26 = arith.constant 0 : index
    %c129 = arith.constant 129 : index
    %50 = vector.load %arg8[%c0_26, %c129] : memref<4x512xf32, #tpu.memory_space<vmem>>, vector<4x256xf32>
    %cst_27 = arith.constant 0.000000e+00 : f32
    %51 = vector.shape_cast %22 : vector<1x256xi1> to vector<1x256xi1>
    %52 = vector.broadcast %51 : vector<1x256xi1> to vector<4x256xi1>
    %53 = vector.broadcast %cst_27 : f32 to vector<4x256xf32>
    %54 = arith.select %52, %50, %53 : vector<4x256xi1>, vector<4x256xf32>
    %c20 = arith.constant 20 : index
    %c0_28 = arith.constant 0 : index
    %55 = vector.load %arg9[%c20, %c0_28] : memref<36x256xf32, #tpu.memory_space<vmem>>, vector<4x256xf32>
    tpu.vector_store %arg9[%c20, %c0_28], %54 {strides = array<i32>} : memref<36x256xf32, #tpu.memory_space<vmem>>, vector<4x256xf32>,
    %c0_29 = arith.constant 0 : index
    %c143 = arith.constant 143 : index
    %56 = vector.load %arg8[%c0_29, %c143] : memref<4x512xf32, #tpu.memory_space<vmem>>, vector<4x256xf32>
    %cst_30 = arith.constant 0.000000e+00 : f32
    %57 = vector.shape_cast %20 : vector<1x256xi1> to vector<1x256xi1>
    %58 = vector.broadcast %57 : vector<1x256xi1> to vector<4x256xi1>
    %59 = vector.broadcast %cst_30 : f32 to vector<4x256xf32>
    %60 = arith.select %58, %56, %59 : vector<4x256xi1>, vector<4x256xf32>
    %c24 = arith.constant 24 : index
    %c0_31 = arith.constant 0 : index
    %61 = vector.load %arg9[%c24, %c0_31] : memref<36x256xf32, #tpu.memory_space<vmem>>, vector<4x256xf32>
    tpu.vector_store %arg9[%c24, %c0_31], %60 {strides = array<i32>} : memref<36x256xf32, #tpu.memory_space<vmem>>, vector<4x256xf32>,
    %c0_32 = arith.constant 0 : index
    %c144 = arith.constant 144 : index
    %62 = vector.load %arg8[%c0_32, %c144] : memref<4x512xf32, #tpu.memory_space<vmem>>, vector<4x256xf32>
    %c28 = arith.constant 28 : index
    %c0_33 = arith.constant 0 : index
    %63 = vector.load %arg9[%c28, %c0_33] : memref<36x256xf32, #tpu.memory_space<vmem>>, vector<4x256xf32>
    tpu.vector_store %arg9[%c28, %c0_33], %62 {strides = array<i32>} : memref<36x256xf32, #tpu.memory_space<vmem>>, vector<4x256xf32>,
    %c0_34 = arith.constant 0 : index
    %c145 = arith.constant 145 : index
    %64 = vector.load %arg8[%c0_34, %c145] : memref<4x512xf32, #tpu.memory_space<vmem>>, vector<4x256xf32>
    %cst_35 = arith.constant 0.000000e+00 : f32
    %65 = vector.shape_cast %22 : vector<1x256xi1> to vector<1x256xi1>
    %66 = vector.broadcast %65 : vector<1x256xi1> to vector<4x256xi1>
    %67 = vector.broadcast %cst_35 : f32 to vector<4x256xf32>
    %68 = arith.select %66, %64, %67 : vector<4x256xi1>, vector<4x256xf32>
    %c32 = arith.constant 32 : index
    %c0_36 = arith.constant 0 : index
    %69 = vector.load %arg9[%c32, %c0_36] : memref<36x256xf32, #tpu.memory_space<vmem>>, vector<4x256xf32>
    tpu.vector_store %arg9[%c32, %c0_36], %68 {strides = array<i32>} : memref<36x256xf32, #tpu.memory_space<vmem>>, vector<4x256xf32>,
    %c0_37 = arith.constant 0 : index
    %c0_38 = arith.constant 0 : index
    %70 = vector.load %arg2[%c0_37, %c0_38] : memref<4x36xf32, #tpu.memory_space<vmem>>, vector<4x36xf32>
    %c0_39 = arith.constant 0 : index
    %c0_40 = arith.constant 0 : index
    %71 = vector.load %arg9[%c0_39, %c0_40] : memref<36x256xf32, #tpu.memory_space<vmem>>, vector<36x256xf32>
    %cst_41 = arith.constant dense<0.000000e+00> : vector<4x256xf32>
    %72 = tpu.matmul %70, %71, %cst_41 {dimension_numbers = #tpu.dot_dimension_numbers<[1], [0], [0], [1], [0, 0, 1, 1], [], []>} : vector<4x36xf32>, vector<36x256xf32>, vector<4x256xf32> -> vector<4x256xf32>
    %c0_42 = arith.constant 0 : index
    %c0_43 = arith.constant 0 : index
    %73 = vector.load %arg3[%c0_42, %c0_43] : memref<4x1xf32, #tpu.memory_space<vmem>>, vector<4x1xf32>
    %74 = vector.broadcast %73 : vector<4x1xf32> to vector<4x256xf32>
    %75 = arith.addf %72, %74 : vector<4x256xf32>
    %cst_44 = arith.constant 0.000000e+00 : f32
    %76 = vector.broadcast %cst_44 : f32 to vector<4x256xf32>
    %77 = arith.cmpf ogt, %75, %76 : vector<4x256xf32>
    %78 = vector.broadcast %26 : f32 to vector<4x256xf32>
    %79 = arith.mulf %78, %75 : vector<4x256xf32>
    %80 = arith.select %77, %75, %79 : vector<4x256xi1>, vector<4x256xf32>
    %c0_45 = arith.constant 0 : index
    %c128_46 = arith.constant 128 : index
    %81 = vector.load %arg8[%c0_45, %c128_46] : memref<4x512xf32, #tpu.memory_space<vmem>>, vector<4x256xf32>
    tpu.vector_store %arg8[%c0_45, %c128_46], %80 {strides = array<i32>} : memref<4x512xf32, #tpu.memory_space<vmem>>, vector<4x256xf32>,
    %c0_47 = arith.constant 0 : index
    %c111_48 = arith.constant 111 : index
    %82 = vector.load %arg8[%c0_47, %c111_48] : memref<4x512xf32, #tpu.memory_space<vmem>>, vector<4x256xf32>
    %cst_49 = arith.constant 0.000000e+00 : f32
    %83 = vector.shape_cast %20 : vector<1x256xi1> to vector<1x256xi1>
    %84 = vector.broadcast %83 : vector<1x256xi1> to vector<4x256xi1>
    %85 = vector.broadcast %cst_49 : f32 to vector<4x256xf32>
    %86 = arith.select %84, %82, %85 : vector<4x256xi1>, vector<4x256xf32>
    %c0_50 = arith.constant 0 : index
    %c0_51 = arith.constant 0 : index
    %87 = vector.load %arg9[%c0_50, %c0_51] : memref<36x256xf32, #tpu.memory_space<vmem>>, vector<4x256xf32>
    tpu.vector_store %arg9[%c0_50, %c0_51], %86 {strides = array<i32>} : memref<36x256xf32, #tpu.memory_space<vmem>>, vector<4x256xf32>,
    %c0_52 = arith.constant 0 : index
    %c112_53 = arith.constant 112 : index
    %88 = vector.load %arg8[%c0_52, %c112_53] : memref<4x512xf32, #tpu.memory_space<vmem>>, vector<4x256xf32>
    %c4_54 = arith.constant 4 : index
    %c0_55 = arith.constant 0 : index
    %89 = vector.load %arg9[%c4_54, %c0_55] : memref<36x256xf32, #tpu.memory_space<vmem>>, vector<4x256xf32>
    tpu.vector_store %arg9[%c4_54, %c0_55], %88 {strides = array<i32>} : memref<36x256xf32, #tpu.memory_space<vmem>>, vector<4x256xf32>,
    %c0_56 = arith.constant 0 : index
    %c113_57 = arith.constant 113 : index
    %90 = vector.load %arg8[%c0_56, %c113_57] : memref<4x512xf32, #tpu.memory_space<vmem>>, vector<4x256xf32>
    %cst_58 = arith.constant 0.000000e+00 : f32
    %91 = vector.shape_cast %22 : vector<1x256xi1> to vector<1x256xi1>
    %92 = vector.broadcast %91 : vector<1x256xi1> to vector<4x256xi1>
    %93 = vector.broadcast %cst_58 : f32 to vector<4x256xf32>
    %94 = arith.select %92, %90, %93 : vector<4x256xi1>, vector<4x256xf32>
    %c8_59 = arith.constant 8 : index
    %c0_60 = arith.constant 0 : index
    %95 = vector.load %arg9[%c8_59, %c0_60] : memref<36x256xf32, #tpu.memory_space<vmem>>, vector<4x256xf32>
    tpu.vector_store %arg9[%c8_59, %c0_60], %94 {strides = array<i32>} : memref<36x256xf32, #tpu.memory_space<vmem>>, vector<4x256xf32>,
    %c0_61 = arith.constant 0 : index
    %c127_62 = arith.constant 127 : index
    %96 = vector.load %arg8[%c0_61, %c127_62] : memref<4x512xf32, #tpu.memory_space<vmem>>, vector<4x256xf32>
    %cst_63 = arith.constant 0.000000e+00 : f32
    %97 = vector.shape_cast %20 : vector<1x256xi1> to vector<1x256xi1>
    %98 = vector.broadcast %97 : vector<1x256xi1> to vector<4x256xi1>
    %99 = vector.broadcast %cst_63 : f32 to vector<4x256xf32>
    %100 = arith.select %98, %96, %99 : vector<4x256xi1>, vector<4x256xf32>
    %c12_64 = arith.constant 12 : index
    %c0_65 = arith.constant 0 : index
    %101 = vector.load %arg9[%c12_64, %c0_65] : memref<36x256xf32, #tpu.memory_space<vmem>>, vector<4x256xf32>
    tpu.vector_store %arg9[%c12_64, %c0_65], %100 {strides = array<i32>} : memref<36x256xf32, #tpu.memory_space<vmem>>, vector<4x256xf32>,
    %c0_66 = arith.constant 0 : index
    %c128_67 = arith.constant 128 : index
    %102 = vector.load %arg8[%c0_66, %c128_67] : memref<4x512xf32, #tpu.memory_space<vmem>>, vector<4x256xf32>
    %c16_68 = arith.constant 16 : index
    %c0_69 = arith.constant 0 : index
    %103 = vector.load %arg9[%c16_68, %c0_69] : memref<36x256xf32, #tpu.memory_space<vmem>>, vector<4x256xf32>
    tpu.vector_store %arg9[%c16_68, %c0_69], %102 {strides = array<i32>} : memref<36x256xf32, #tpu.memory_space<vmem>>, vector<4x256xf32>,
    %c0_70 = arith.constant 0 : index
    %c129_71 = arith.constant 129 : index
    %104 = vector.load %arg8[%c0_70, %c129_71] : memref<4x512xf32, #tpu.memory_space<vmem>>, vector<4x256xf32>
    %cst_72 = arith.constant 0.000000e+00 : f32
    %105 = vector.shape_cast %22 : vector<1x256xi1> to vector<1x256xi1>
    %106 = vector.broadcast %105 : vector<1x256xi1> to vector<4x256xi1>
    %107 = vector.broadcast %cst_72 : f32 to vector<4x256xf32>
    %108 = arith.select %106, %104, %107 : vector<4x256xi1>, vector<4x256xf32>
    %c20_73 = arith.constant 20 : index
    %c0_74 = arith.constant 0 : index
    %109 = vector.load %arg9[%c20_73, %c0_74] : memref<36x256xf32, #tpu.memory_space<vmem>>, vector<4x256xf32>
    tpu.vector_store %arg9[%c20_73, %c0_74], %108 {strides = array<i32>} : memref<36x256xf32, #tpu.memory_space<vmem>>, vector<4x256xf32>,
    %c0_75 = arith.constant 0 : index
    %c143_76 = arith.constant 143 : index
    %110 = vector.load %arg8[%c0_75, %c143_76] : memref<4x512xf32, #tpu.memory_space<vmem>>, vector<4x256xf32>
    %cst_77 = arith.constant 0.000000e+00 : f32
    %111 = vector.shape_cast %20 : vector<1x256xi1> to vector<1x256xi1>
    %112 = vector.broadcast %111 : vector<1x256xi1> to vector<4x256xi1>
    %113 = vector.broadcast %cst_77 : f32 to vector<4x256xf32>
    %114 = arith.select %112, %110, %113 : vector<4x256xi1>, vector<4x256xf32>
    %c24_78 = arith.constant 24 : index
    %c0_79 = arith.constant 0 : index
    %115 = vector.load %arg9[%c24_78, %c0_79] : memref<36x256xf32, #tpu.memory_space<vmem>>, vector<4x256xf32>
    tpu.vector_store %arg9[%c24_78, %c0_79], %114 {strides = array<i32>} : memref<36x256xf32, #tpu.memory_space<vmem>>, vector<4x256xf32>,
    %c0_80 = arith.constant 0 : index
    %c144_81 = arith.constant 144 : index
    %116 = vector.load %arg8[%c0_80, %c144_81] : memref<4x512xf32, #tpu.memory_space<vmem>>, vector<4x256xf32>
    %c28_82 = arith.constant 28 : index
    %c0_83 = arith.constant 0 : index
    %117 = vector.load %arg9[%c28_82, %c0_83] : memref<36x256xf32, #tpu.memory_space<vmem>>, vector<4x256xf32>
    tpu.vector_store %arg9[%c28_82, %c0_83], %116 {strides = array<i32>} : memref<36x256xf32, #tpu.memory_space<vmem>>, vector<4x256xf32>,
    %c0_84 = arith.constant 0 : index
    %c145_85 = arith.constant 145 : index
    %118 = vector.load %arg8[%c0_84, %c145_85] : memref<4x512xf32, #tpu.memory_space<vmem>>, vector<4x256xf32>
    %cst_86 = arith.constant 0.000000e+00 : f32
    %119 = vector.shape_cast %22 : vector<1x256xi1> to vector<1x256xi1>
    %120 = vector.broadcast %119 : vector<1x256xi1> to vector<4x256xi1>
    %121 = vector.broadcast %cst_86 : f32 to vector<4x256xf32>
    %122 = arith.select %120, %118, %121 : vector<4x256xi1>, vector<4x256xf32>
    %c32_87 = arith.constant 32 : index
    %c0_88 = arith.constant 0 : index
    %123 = vector.load %arg9[%c32_87, %c0_88] : memref<36x256xf32, #tpu.memory_space<vmem>>, vector<4x256xf32>
    tpu.vector_store %arg9[%c32_87, %c0_88], %122 {strides = array<i32>} : memref<36x256xf32, #tpu.memory_space<vmem>>, vector<4x256xf32>,
    %c0_89 = arith.constant 0 : index
    %c0_90 = arith.constant 0 : index
    %124 = vector.load %arg5[%c0_89, %c0_90] : memref<4x36xf32, #tpu.memory_space<vmem>>, vector<4x36xf32>
    %c0_91 = arith.constant 0 : index
    %c0_92 = arith.constant 0 : index
    %125 = vector.load %arg9[%c0_91, %c0_92] : memref<36x256xf32, #tpu.memory_space<vmem>>, vector<36x256xf32>
    %cst_93 = arith.constant dense<0.000000e+00> : vector<4x256xf32>
    %126 = tpu.matmul %124, %125, %cst_93 {dimension_numbers = #tpu.dot_dimension_numbers<[1], [0], [0], [1], [0, 0, 1, 1], [], []>} : vector<4x36xf32>, vector<36x256xf32>, vector<4x256xf32> -> vector<4x256xf32>
    %c0_94 = arith.constant 0 : index
    %c0_95 = arith.constant 0 : index
    %127 = vector.load %arg6[%c0_94, %c0_95] : memref<4x1xf32, #tpu.memory_space<vmem>>, vector<4x1xf32>
    %128 = vector.broadcast %127 : vector<4x1xf32> to vector<4x256xf32>
    %129 = arith.addf %126, %128 : vector<4x256xf32>
    %130 = arith.addf %1, %129 : vector<4x256xf32>
    %c0_96 = arith.constant 0 : index
    %c0_97 = arith.constant 0 : index
    %c0_98 = arith.constant 0 : index
    %131 = vector.load %arg7[%c0_96, %c0_97, %c0_98] : memref<1x4x256xf32, #tpu.memory_space<vmem>>, vector<1x4x256xf32>
    %132 = vector.shape_cast %131 : vector<1x4x256xf32> to vector<4x256xf32>
    %133 = vector.shape_cast %130 : vector<4x256xf32> to vector<1x4x256xf32>
    tpu.vector_store %arg7[%c0_96, %c0_97, %c0_98], %133 {strides = array<i32>} : memref<1x4x256xf32, #tpu.memory_space<vmem>>, vector<1x4x256xf32>,
    return
  }
  func.func @transform_0(%arg0: i32) -> (i32, i32, i32) {
    %c0_i32 = arith.constant 0 : i32
    %c0_i32_0 = arith.constant 0 : i32
    %c0_i32_1 = arith.constant 0 : i32
    return %arg0, %c0_i32, %c0_i32_0 : i32, i32, i32
  }
  func.func @transform_1(%arg0: i32) -> (i32, i32) {
    %c0_i32 = arith.constant 0 : i32
    %c0_i32_0 = arith.constant 0 : i32
    %c0_i32_1 = arith.constant 0 : i32
    return %c0_i32, %c0_i32_0 : i32, i32
  }
  func.func @transform_2(%arg0: i32) -> (i32, i32) {
    %c0_i32 = arith.constant 0 : i32
    %c0_i32_0 = arith.constant 0 : i32
    %c0_i32_1 = arith.constant 0 : i32
    return %c0_i32, %c0_i32_0 : i32, i32
  }
  func.func @transform_3(%arg0: i32) -> i32 {
    %c0_i32 = arith.constant 0 : i32
    %c0_i32_0 = arith.constant 0 : i32
    return %c0_i32 : i32
  }
  func.func @transform_4(%arg0: i32) -> (i32, i32) {
    %c0_i32 = arith.constant 0 : i32
    %c0_i32_0 = arith.constant 0 : i32
    %c0_i32_1 = arith.constant 0 : i32
    return %c0_i32, %c0_i32_0 : i32, i32
  }
  func.func @transform_5(%arg0: i32) -> (i32, i32) {
    %c0_i32 = arith.constant 0 : i32
    %c0_i32_0 = arith.constant 0 : i32
    %c0_i32_1 = arith.constant 0 : i32
    return %c0_i32, %c0_i32_0 : i32, i32
  }
  func.func @transform_6(%arg0: i32) -> (i32, i32, i32) {
    %c0_i32 = arith.constant 0 : i32
    %c0_i32_0 = arith.constant 0 : i32
    %c0_i32_1 = arith.constant 0 : i32
    return %arg0, %c0_i32, %c0_i32_0 : i32, i32, i32
  }
}

</mosaic_0001>

<bundles_post_ra>
// kernel: tpu_custom_call.1
= control target key start
LH: loop header
LB: loop body
LE: loop exit
PB: predicated region body
PF: predicated region fallthrough
CT: control target
= control target key end

     0   :  { %s1553_s0 = inlined_call_operand.hbm [shape: f32[2,4,256], index: 0, kind: input, shape index: {}]   ;;  %s1554_s1 = inlined_call_operand.vmem [shape: f32[4,36], index: 1, kind: input, shape index: {}]   ;;  %s1555_s2 = inlined_call_operand.vmem [shape: f32[4,1], index: 2, kind: input, shape index: {}]   ;;  %s1556_s3 = inlined_call_operand.<no memory space> [shape: f32[1], index: 3, kind: input, shape index: {}]   ;;  %s1557_s4 = inlined_call_operand.vmem [shape: f32[4,36], index: 4, kind: input, shape index: {}]   ;;  %s1558_s5 = inlined_call_operand.vmem [shape: f32[4,1], index: 5, kind: input, shape index: {}]   ;;  %s1559_s6 = inlined_call_operand.hbm [shape: f32[2,4,256], index: 6, kind: output, shape index: {}]  }
   0x1   :  { %11 = sst [smem:[#allocation4]] %s1556_s3 }
   0x2   :  { %12 = vsyncpa [#allocation6], 0 }
   0x3   :  { %14 = vsyncpa [#allocation6 + $0x1], 0 }
   0x4   :  { %15 = vsyncpa [#allocation7], 0 }
   0x5   :  { %17 = vsyncpa [#allocation7 + $0x1], 0  ;;  %s1216_s23 = smov 0   ;;  %s1218_s24 = smov 0  }
   0x6   :  { %s1220_s25 = smov 0   ;;  %s1222_s26 = smov 0  }
   0x7 LB: > { %s1237_s3 = sadd.s32 4294967295, %s1166_s26   ;;  %s988_s27 = sadd.s32 4294967294, %s1166_s26   ;;  %s1166_s26 = sphi %s1222_s26, %s1577_s26   ;;  %s1162_s25 = sphi %s1220_s25, %s1576_s25   ;;  %s1158_s24 = sphi %s1218_s24, %s1575_s24   ;;  %s1154_s23 = sphi %s1216_s23, %s1574_s23  }
   0x8   : > { %s1241_s28 = sadd.s32 1, %s1166_s26   ;;  %s30_s29 = sadd.s32 1, %s1162_s25 }
   0x9   : > { %s27_s30 = ssub.s32 %s1166_s26, %s1241_s28  ;;  %p37_p0 = scmp.ne.s32.totalorder %s1162_s25, %s1158_s24 }
   0xa   : > { %p28_p1 = scmp.eq.s32.totalorder %s27_s30, 0  ;;  %p38_p2 = scmp.eq.s32.totalorder %s1166_s26, 0 }
   0xb   : > { %p43_p3 = scmp.ne.s32.totalorder %s1158_s24, %s1154_s23  ;;  %p44_p4 = scmp.eq.s32.totalorder %s1237_s3, 0 }
   0xc   : > { %s1253_s7 = scalar_select %p28_p1, %s1162_s25, %s30_s29  }
   0xd   : > { %p1255_p5 = por %p38_p2, %p37_p0  ;;  %p1259_p6 = por %p44_p4, %p43_p3 }
   0xe   : > { %p172_p7 = scmp.eq.s32.totalorder %s1237_s3, 1  ;;  %p178_p8 = scmp.eq.s32.totalorder %s988_s27, 1 }
   0xf   : > { %p1024_p10 = scmp.lt.s32.totalorder %s1166_s26, 2  ;;  %s213_s12 = sand.u32 1, %s1162_s25  }
  0x10   : > { %p1266_p11 = por %p172_p7, %p37_p0  ;;  %p1270_p12 = por %p178_p8, %p43_p3 }
  0x11   : > { %s1010_s13 = sshll.u32 %s1166_s26, 3  ;;  %s991_s14 = sshll.u32 %s213_s12, 3 }
  0x12   : > { %s222_s17 = scalar_lea.hbm %s1553_s0, %s1010_s13  ;;  %s217_s19 = scalar_lea.vmem [#allocation5], %s991_s14 }
  0x13   : > { %s224_s18 = sshll.u32 %s222_s17, 4  ;;  %s226_s20 = sshll.u32 %s217_s19, 4  ;;  %s225_s18 = int_to_ptr.hbm [resolvable:$true] %s224_s18  ;;  %s227_s20 = int_to_ptr.vmem [resolvable:$true] %s226_s20 }
  0x14   : > { %p1281_p13 = pnand %p1024_p10, %p1255_p5  ;;  %p994_p0 = scmp.ge.s32.totalorder %s1166_s26, 1 }
  0x15   : > { %p231_p1 = scmp.lt.s32.totalorder %s1166_s26, 3  ;;  %s214_s22 = scalar_lea.sflag [#allocation6], %s213_s12 }
  0x16   : > { %s1070_s27 = sshra.s32 %s225_s18, 4  ;;  %p1074_p3 = pneg %p1281_p13  ;;  %s1071_s27 = int_to_ptr.hbm [resolvable:$true] %s1070_s27 }
  0x17   : > { %s1072_s29 = scalar_lea.hbm %s1071_s27, 8  ;;  %s1077_s8 = scalar_lea.hbm %s1553_s0, 16 }
  0x18   : > { %p1073_p2 = scmp.ne.s32.totalorder %s1071_s27, %s1072_s29  ;;  %p1078_p5 = scmp.lt.s32.totalorder %s1071_s27, %s1553_s0 }
  0x19   : > { %p1079_p8 = scmp.lt.s32.totalorder %s1077_s8, %s1072_s29 }
  0x1a   : > { %p1075_p4 = pnand %p1074_p3, %p1073_p2 }
  0x1b   : > { %p1080_p10 = por %p1079_p8, %p1078_p5 }
  0x1c   : > { %p1076_p7 = pneg %p1075_p4 }
  0x1e   : > { %p1081_p9 = pnand %p1080_p10, %p1076_p7 }
  0x20   : > { %1084 = shalt.err (!%p1081_p9)
}
  0x21   : > { %1019 = dma.hbm_to_vmem [thread:$0]  (!%p1281_p13), %s225_s18, 128, %s227_s20, %s214_s22  }
  0x22   : > { %p232_p2 = pnand %p994_p0, %p231_p1 }
  0x23   : > { %s1302_s12 = sand.u32 (!%p232_p2), 1, %s1158_s24  }
  0x24   : > { %235 = sbr.rel (%p232_p2) target bundleno = 770 (0x302), region = 44  ;;  %s995_s16 = sshll.u32 (!%p232_p2), %s1302_s12, 3 }
  0x25   : > { %s238_s17 = scalar_lea.sflag (!%p232_p2), [#allocation6], %s1302_s12  ;;  %s241_s19 = scalar_lea.vmem (!%p232_p2), [#allocation5], %s995_s16 }
  0x29   : > { %1145 = dma.done.wait (%p1259_p6), %s238_s17, 128  }
  0x2a   : > { %1147 = vsyncadd (%p1259_p6), %s238_s17, 4294967168  ;;  %vm303_vm0 = vcmask 1044344   ;;  %v1168_v0 = vmov 0.0   ;;  %v1312_v1 = vld [vmem:[%s241_s19] sm:$0xff]  ;;  %vm305_vm1 = vcmask 134144   ;;  %s1169_s18 = smov 17   ;;  %v272_v37 = vlaneseq }
  0x2b   : > { %304 = vst.msk [vmem:[#allocation2] sm:$0xf] %vm303_vm0, %v1168_v0  ;;  %s1170_s9 = smov 16   ;;  %s1171_s20 = smov 15   ;;  %vm329_vm2 = vcmask 138240   ;;  %vm382_vm4 = vcmask 121856  }
  0x2c   : > { %308 = vst [vmem:[#allocation2 + $0x4] sm:$0xff] %v1312_v1  ;;  %s1172_s21 = smov 1   ;;  %s1173_s22 = smov 113   ;;  %v273_v38 = vand.u32 127, %v272_v37  ;;  %vm407_vm7 = vcmask 7168   ;;  %vm478_vm9 = vcmask 924672  }
  0x2d   : > { %306 = vst.msk [vmem:[#allocation2 + $0xc] sm:$0xf] %vm305_vm1, %v1168_v0  ;;  %s1174_s27 = smov 127   ;;  %s1175_s29 = smov 111   ;;  %vm447_vm10 = vcmask 1039360   ;;  %vm355_vm11 = vcmask 130048  }
  0x2e   : > { %s1176_s30 = smov 112   ;;  %v274_v40 = vadd.s32 128, %v273_v38  ;;  %v279_v48 = vand.u32 15, %v273_v38  ;;  %vm504_vm12 = vcmask 916480   ;;  %vm527_vm13 = vcmask 908288   ;;  %s307_s17 = sld [smem:[#allocation4]] }
  0x2f   : > { %vm557_vm14 = vcmask 1043456   ;;  %vm553_vm15 = vcmask 293888   ;;  %v839_v43 = vld [vmem:[%s1558_s5] sm:$0xf] }
  0x30   : > { %v286_v41 = vand.u32 15, %v274_v40  ;;  %vm1365_vm5 = vcmp.lt.s32.totalorder %v279_v48, 15  ;;  %vm1382_vm8 = vcmp.ge.s32.totalorder %v279_v48, 1 }
  0x32   : > { %vm1357_vm3 = vcmp.ge.s32.totalorder %v286_v41, 1  ;;  %vm1369_vm6 = vcmp.lt.s32.totalorder %v286_v41, 15 }
  0x33   : > { %v310_v2 = vld [vmem:[#allocation2 + $0x8] sm:$0xf]  ;;  %v309_v3 = vld [vmem:[#allocation2] sm:$0xff] }
  0x34   : > { %319 = vst [vmem:[#allocation1 + $0x10] ss:$2 sm:$0xff] %v310_v2  ;;  %v339_v5 = vld [vmem:[#allocation2 + $0x8] sm:$0xf]  ;;  %v432_v16 = vld [vmem:[#allocation2 + $0xc] sm:$0xf] }
  0x35   : > { %317 = vst [vmem:[#allocation1] ss:$2 sm:$0xff] %v309_v3  ;;  %v363_v8 = vld [vmem:[#allocation2 + $0x8] sm:$0xf]  ;;  %v463_v20 = vld [vmem:[#allocation2 + $0xc] sm:$0xf] }
  0x36   : > { %v392_v12 = vld [vmem:[#allocation2 + $0x8] sm:$0xf]  ;;  %v488_v24 = vld [vmem:[#allocation2 + $0xc] sm:$0xf] }
  0x37   : > { %v512_v28 = vld [vmem:[#allocation2 + $0xc] sm:$0xf] }
  0x3b   : > { %v322_v4 = vld.sshfl [vmem:[#allocation1 + $0x10] sm:$0xff pattern:$0x75316420] }
  0x3c   : > { %327 = vrot.lane.b32.xlu0 %v322_v4, %s1169_s18  ;;  %v321_v6 = vld.sshfl [vmem:[#allocation1 + $0x8] sm:$0xff pattern:$0x75316420]  ;;  %v1316_v7 = vld.sshfl [vmem:[#allocation1] sm:$0xff pattern:$0x75316420] }
  0x3d   : > { %325 = vrot.lane.b32.xlu2 %v321_v6, %s1169_s18  ;;  %343 = vst [vmem:[#allocation1 + $0x1] ss:$2 sm:$0xff] %v309_v3 }
  0x3e   : > { %345 = vst [vmem:[#allocation1 + $0x11] ss:$2 sm:$0xff] %v339_v5 }
  0x44   : > { %v1319_v9 = vld.sshfl [vmem:[#allocation1] sm:$0xff pattern:$0x75316420]  ;;  %v347_v10 = vld.sshfl [vmem:[#allocation1 + $0x8] sm:$0xff pattern:$0x75316420] }
  0x45   : > { %370 = vst [vmem:[#allocation1] ss:$2 sm:$0xff] %v309_v3  ;;  %v1321_v11 = vld.sshfl [vmem:[#allocation1 + $0x10] sm:$0xff pattern:$0x75316420]  ;;  %351 = vrot.lane.b32.xlu2 %v347_v10, %s1170_s9 }
  0x46   : > { %372 = vst [vmem:[#allocation1 + $0x10] ss:$2 sm:$0xff] %v363_v8 }
  0x4c   : > { %v373_v13 = vld.sshfl [vmem:[#allocation1] sm:$0xff pattern:$0x75316420]  ;;  %v374_v14 = vld.sshfl [vmem:[#allocation1 + $0x8] sm:$0xff pattern:$0x75316420] }
  0x4d   : > { %376 = vrot.lane.b32.xlu1 %v373_v13, %s1171_s20  ;;  %v375_v15 = vld.sshfl [vmem:[#allocation1 + $0x10] sm:$0xff pattern:$0x75316420]  ;;  %395 = vst [vmem:[#allocation1] ss:$2 sm:$0xff] %v309_v3  ;;  %378 = vrot.lane.b32.xlu2 %v374_v14, %s1171_s20 }
  0x4e   : > { %380 = vrot.lane.b32.xlu0 %v375_v15, %s1171_s20  ;;  %397 = vst [vmem:[#allocation1 + $0x10] ss:$2 sm:$0xff] %v392_v12 }
  0x54   : > { %v399_v17 = vld.sshfl [vmem:[#allocation1 + $0x8] sm:$0xff pattern:$0x75316420]  ;;  %v398_v18 = vld.sshfl [vmem:[#allocation1] sm:$0xff pattern:$0x75316420] }
  0x55   : > { %v400_v19 = vld.sshfl [vmem:[#allocation1 + $0x10] sm:$0xff pattern:$0x75316420]  ;;  %424 = vst [vmem:[#allocation1] ss:$2 sm:$0xff] %v1312_v1 }
  0x56   : > { %405 = vrot.lane.b32.xlu1 %v400_v19, %s1172_s21  ;;  %403 = vrot.lane.b32.xlu0 %v399_v17, %s1172_s21  ;;  %437 = vst [vmem:[#allocation1 + $0x10] ss:$2 sm:$0xff] %v432_v16 }
  0x5c   : > { %v425_v21 = vld.sshfl [vmem:[#allocation1] sm:$0xff pattern:$0x75316420]  ;;  %v426_v22 = vld.sshfl [vmem:[#allocation1 + $0x8] sm:$0xff pattern:$0x75316420] }
  0x5d   : > { %v440_v23 = vld.sshfl [vmem:[#allocation1 + $0x10] sm:$0xff pattern:$0x75316420]  ;;  %435 = vst [vmem:[#allocation1] ss:$2 sm:$0xff] %v1312_v1 }
  0x5e   : > { %401 = vrot.lane.b32.xlu1 %v398_v18, %s1172_s21  ;;  %468 = vst [vmem:[#allocation1 + $0x10] ss:$2 sm:$0xff] %v463_v20 }
  0x5f   : > { %429 = vst [vmem:[#allocation3 + $0x48] sm:$0xf] %v425_v21 }
  0x60   : > { %430 = vst [vmem:[#allocation3 + $0x28] sm:$0xf] %v426_v22 }
  0x64   : > { %v439_v25 = vld.sshfl [vmem:[#allocation1 + $0x8] sm:$0xff pattern:$0x75316420]  ;;  %v438_v26 = vld.sshfl [vmem:[#allocation1] sm:$0xff pattern:$0x75316420] }
  0x65   : > { %v471_v27 = vld.sshfl [vmem:[#allocation1 + $0x10] sm:$0xff pattern:$0x75316420]  ;;  %466 = vst [vmem:[#allocation1] ss:$2 sm:$0xff] %v1312_v1 }
  0x66   : > { %476 = vrot.lane.b32.xlu2 %v471_v27, %s1173_s22  ;;  %445 = vrot.lane.b32.xlu1 %v440_v23, %s1174_s27  ;;  %494 = vst [vmem:[#allocation1 + $0x11] ss:$2 sm:$0xff] %v488_v24  ;;  %v1177_v27 = vmov 0  }
  0x67   : > { %1068 = vset.pattern.permute.xlu0 %v1177_v27  ;;  %1069 = vset.pattern.permute.xlu2 %v1177_v27 }
  0x6c   : > { %v469_v29 = vld.sshfl [vmem:[#allocation1] sm:$0xff pattern:$0x75316420]  ;;  %v470_v30 = vld.sshfl [vmem:[#allocation1 + $0x8] sm:$0xff pattern:$0x75316420] }
  0x6d   : > { %472 = vrot.lane.b32.xlu0 %v469_v29, %s1173_s22  ;;  %v497_v31 = vld.sshfl [vmem:[#allocation1 + $0x10] sm:$0xff pattern:$0x75316420]  ;;  %492 = vst [vmem:[#allocation1 + $0x1] ss:$2 sm:$0xff] %v1312_v1 }
  0x6e   : > { %443 = vrot.lane.b32.xlu1 %v439_v25, %s1174_s27  ;;  %441 = vrot.lane.b32.xlu2 %v438_v26, %s1174_s27  ;;  %517 = vst [vmem:[#allocation1 + $0x10] ss:$2 sm:$0xff] %v512_v28  ;;  %v547_v26 = vld [vmem:[%s1555_s2] sm:$0xf] }
  0x74   : > { %v496_v32 = vld.sshfl [vmem:[#allocation1 + $0x8] sm:$0xff pattern:$0x75316420]  ;;  %v495_v33 = vld.sshfl [vmem:[#allocation1] sm:$0xff pattern:$0x75316420] }
  0x75   : > { %v520_v34 = vld.sshfl [vmem:[#allocation1 + $0x10] sm:$0xff pattern:$0x75316420]  ;;  %515 = vst [vmem:[#allocation1] ss:$2 sm:$0xff] %v1312_v1 }
  0x76   : > { %474 = vrot.lane.b32.xlu2 %v470_v30, %s1173_s22  ;;  %525 = vrot.lane.b32.xlu0 %v520_v34, %s1175_s29 }
  0x77   : > { %500 = vrot.lane.b32.xlu1 %v496_v32, %s1176_s30 }
  0x7c   : > { %v519_v35 = vld.sshfl [vmem:[#allocation1 + $0x8] sm:$0xff pattern:$0x75316420]  ;;  %v518_v36 = vld.sshfl [vmem:[#allocation1] sm:$0xff pattern:$0x75316420] }
  0x7e   : > { %502 = vrot.lane.b32.xlu2 %v497_v31, %s1176_s30  ;;  %523 = vrot.lane.b32.xlu0 %v519_v35, %s1175_s29 }
  0x7f   : > { %498 = vrot.lane.b32.xlu1 %v495_v33, %s1176_s30 }
  0x86   : > { %349 = vrot.lane.b32.xlu2 %v1319_v9, %s1170_s9  ;;  %521 = vrot.lane.b32.xlu0 %v518_v36, %s1175_s29 }
  0x87   : > { %323 = vrot.lane.b32.xlu1 %v1316_v7, %s1169_s18 }
  0x8e   : > { %353 = vrot.lane.b32.xlu0 %v1321_v11, %s1170_s9 }
  0x96   : > { %550 = vperm.xlu0 %1068, %v547_v26  }
  0x97   : > { %v1353_v39 = vpop.permute.xlu2 %325 }
  0x9f   : > { %v1355_v42 = vpop.permute.xlu2 %351 }
  0xa7   : > { %v379_v47 = vpop.permute.xlu2 %378 }
  0xae   : > { %v328_v44 = vpop.permute.xlu0 %327 }
  0xaf   : > { %v331_v45 = vsel %vm329_vm2, %v1353_v39, %v328_v44 }
  0xb0   : > { %v335_v46 = vsel %vm1357_vm3, %v331_v45, 0.0 }
  0xb1   : > { %337 = vst [vmem:[#allocation3] sm:$0xf] %v335_v46 }
  0xbf   : > { %v377_v50 = vpop.permute.xlu1 %376 }
  0xc0   : > { %v477_v52 = vpop.permute.xlu2 %476  ;;  %v383_v53 = vsel %vm382_vm4, %v377_v50, %v379_v47  ;;  %v381_v54 = vpop.permute.xlu0 %380 }
  0xc1   : > { %v387_v55 = vsel %vm1365_vm5, %v383_v53, 0.0  ;;  %v384_v56 = vsel %vm382_vm4, %v379_v47, %v381_v54  ;;  %v536_v53 = vld [vmem:[%s1554_s1] sm:$0xf] }
  0xc2   : > { %389 = vst [vmem:[#allocation3 + $0x18] sm:$0xf] %v387_v55  ;;  %v388_v57 = vsel %vm1369_vm6, %v384_v56, 0.0 }
  0xc3   : > { %390 = vst [vmem:[#allocation3 + $0x10] sm:$0xf] %v388_v57  ;;  %v606_v57 = vstv %s307_s17 }
  0xc8   : > { %v406_v58 = vpop.permute.xlu1 %405  ;;  %v442_v59 = vpop.permute.xlu2 %441 }
  0xc9   : > { %v404_v60 = vpop.permute.xlu0 %403 }
  0xca   : > { %v409_v61 = vsel %vm407_vm7, %v404_v60, %v406_v58 }
  0xcb   : > { %v413_v62 = vsel %vm1357_vm3, %v409_v61, 0.0 }
  0xcc   : > { %v417_v63 = vrot.slane %v413_v62, 4 }
  0xce   : > { %421 = vst [vmem:[#allocation3 + $0x10] sm:$0xf0] %v417_v63 }
  0xd0   : > { %v402_v2 = vpop.permute.xlu1 %401  ;;  %v475_v3 = vpop.permute.xlu2 %474 }
  0xd1   : > { %v408_v4 = vsel %vm407_vm7, %v402_v2, %v404_v60  ;;  %v480_v5 = vsel %vm478_vm9, %v475_v3, %v477_v52 }
  0xd2   : > { %v412_v6 = vsel %vm1382_vm8, %v408_v4, 0.0  ;;  %v484_v7 = vsel %vm1357_vm3, %v480_v5, 0.0 }
  0xd3   : > { %v416_v8 = vrot.slane %v412_v6, 4  ;;  %486 = vst [vmem:[#allocation3 + $0x20] sm:$0xf] %v484_v7 }
  0xd5   : > { %420 = vst [vmem:[#allocation3 + $0x18] sm:$0xf0] %v416_v8 }
  0xd8   : > { %v446_v9 = vpop.permute.xlu1 %445  ;;  %v503_v10 = vpop.permute.xlu2 %502 }
  0xdc   : > { %v539_v52 = vld [vmem:[#allocation3 + $0x18] sm:$0xff] }
  0xdf   : > { %v473_v11 = vpop.permute.xlu0 %472 }
  0xe0   : > { %v444_v12 = vpop.permute.xlu1 %443  ;;  %v350_v13 = vpop.permute.xlu2 %349  ;;  %v479_v14 = vsel %vm478_vm9, %v473_v11, %v475_v3 }
  0xe1   : > { %v448_v15 = vsel %vm447_vm10, %v442_v59, %v444_v12  ;;  %v449_v16 = vsel %vm447_vm10, %v444_v12, %v446_v9  ;;  %v356_v17 = vsel %vm355_vm11, %v350_v13, %v1355_v42  ;;  %v483_v18 = vsel %vm1382_vm8, %v479_v14, 0.0 }
  0xe2   : > { %v452_v19 = vsel %vm1365_vm5, %v448_v15, 0.0  ;;  %v453_v20 = vsel %vm1369_vm6, %v449_v16, 0.0  ;;  %360 = vst [vmem:[#allocation3 + $0x30] sm:$0xf0] %v356_v17 }
  0xe3   : > { %v456_v21 = vrot.slane %v452_v19, 4  ;;  %v457_v22 = vrot.slane %v453_v20, 4  ;;  %485 = vst [vmem:[#allocation3 + $0x8] sm:$0xf] %v483_v18  ;;  %v728_v19 = vld [vmem:[#allocation2 + $0xc] sm:$0xf] }
  0xe5   : > { %460 = vst [vmem:[#allocation3 + $0x48] sm:$0xf0] %v456_v21 }
  0xe6   : > { %461 = vst [vmem:[#allocation3 + $0x28] sm:$0xf0] %v457_v22 }
  0xe8   : > { %v526_v23 = vpop.permute.xlu0 %525 }
  0xe9   : > { %v501_v24 = vpop.permute.xlu1 %500 }
  0xea   : > { %v506_v25 = vsel %vm504_vm12, %v501_v24, %v503_v10 }
  0xeb   : > { %510 = vst [vmem:[#allocation3 + $0x20] sm:$0xf0] %v506_v25 }
  0xec   : > { %v541_v50 = vld [vmem:[#allocation3 + $0x48] sm:$0xff] }
  0xed   : > { %v542_v44 = vld [vmem:[#allocation3 + $0x28] sm:$0xff] }
  0xf0   : > { %v524_v28 = vpop.permute.xlu0 %523 }
  0xf1   : > { %v499_v29 = vpop.permute.xlu1 %498  ;;  %v529_v30 = vsel %vm527_vm13, %v524_v28, %v526_v23  ;;  %v758_v23 = vld [vmem:[#allocation2 + $0xc] sm:$0xf] }
  0xf2   : > { %v505_v31 = vsel %vm504_vm12, %v499_v29, %v501_v24  ;;  %v533_v32 = vsel %vm1369_vm6, %v529_v30, 0.0  ;;  %v544_v41 = vld [vmem:[#allocation3 + $0x20] sm:$0xff]  ;;  %v782_v29 = vld [vmem:[#allocation2 + $0xc] sm:$0xf] }
  0xf3   : > { %509 = vst [vmem:[#allocation3 + $0x8] sm:$0xf0] %v505_v31 }
  0xf4   : > { %535 = vst [vmem:[#allocation3 + $0x38] sm:$0xf] %v533_v32 }
  0xf8   : > { %v522_v33 = vpop.permute.xlu0 %521 }
  0xf9   : > { %v324_v34 = vpop.permute.xlu1 %323  ;;  %v528_v35 = vsel %vm527_vm13, %v522_v33, %v524_v28  ;;  %v805_v33 = vld [vmem:[#allocation2 + $0xc] sm:$0xf] }
  0xfa   : > { %v330_v36 = vsel %vm329_vm2, %v324_v34, %v1353_v39  ;;  %v532_v37 = vsel %vm1365_vm5, %v528_v35, 0.0  ;;  %v540_v39 = vld [vmem:[#allocation3 + $0x10] sm:$0xff]  ;;  %v543_v48 = vld [vmem:[#allocation3 + $0x8] sm:$0xff] }
  0xfb   : > { %v334_v38 = vsel %vm1382_vm8, %v330_v36, 0.0  ;;  %534 = vst [vmem:[#allocation3 + $0x40] sm:$0xf] %v532_v37  ;;  %v546_v40 = vld [vmem:[#allocation3 + $0x38] sm:$0xf] }
  0xfc   : > { %336 = vst [vmem:[#allocation3 + $0x30] sm:$0xf] %v334_v38  ;;  %999 = vmatpush.msk.msra.mxu1 %vm557_vm14, %v546_v40 }
  0xfe   : > { %596 = vmatpush.msra.mxu1 %v544_v41 }
 0x100   : > { %597 = vmatpush.msra.mxu1 %v542_v44  ;;  %v354_v45 = vpop.permute.xlu0 %353 }
 0x101   : > { %v357_v46 = vsel %vm355_vm11, %v1355_v42, %v354_v45 }
 0x102   : > { %361 = vst [vmem:[#allocation3] sm:$0xf0] %v357_v46  ;;  %598 = vmatpush.msra.mxu1 %v540_v39  ;;  %v545_v47 = vld [vmem:[#allocation3 + $0x40] sm:$0xf] }
 0x103   : > { %997 = vmatpush.msk.msra.mxu0 %vm557_vm14, %v545_v47  ;;  %v537_v42 = vld [vmem:[#allocation3 + $0x30] sm:$0xff] }
 0x105   : > { %576 = vmatpush.msra.mxu0 %v543_v48 }
 0x107   : > { %577 = vmatpush.msra.mxu0 %v541_v50 }
 0x108   : > { %v551_v55 = vpop.permute.xlu0 %550 }
 0x109   : > { %578 = vmatpush.msra.mxu0 %v539_v52  ;;  %v538_v54 = vld [vmem:[#allocation3] sm:$0xff] }
 0x10a   : > { %599 = vmatpush.msra.mxu1 %v538_v54 }
 0x10b   : > { %579 = vmatpush.msra.mxu0 %v537_v42  ;;  %1000 = vmatmul.msk.f32.vlgmr.msra.gmra.mxu1 %vm553_vm15, %v536_v53 }
 0x10c   : > { %998 = vmatmul.msk.f32.vlgmr.msra.gmra.mxu0 %vm553_vm15, %v536_v53 }
 0x188   : > { %v601_v56 = vpop.f32.mrf.mxu1 }
 0x189   : > { %v602_v58 = vadd.f32 %v601_v56, %v551_v55  ;;  %v581_v59 = vpop.f32.mrf.mxu0 }
 0x18a   : > { %v582_v60 = vadd.f32 %v581_v59, %v551_v55 }
 0x18b   : > { %vm605_vm0 = vcmp.gt.f32.partialorder %v602_v58, 0.0  ;;  %v608_v61 = vmul.f32 %v606_v57, %v602_v58 }
 0x18c   : > { %vm604_vm1 = vcmp.gt.f32.partialorder %v582_v60, 0.0  ;;  %v607_v62 = vmul.f32 %v606_v57, %v582_v60 }
 0x18d   : > { %v610_v63 = vsel %vm605_vm0, %v602_v58, %v608_v61 }
 0x18e   : > { %v609_v2 = vsel %vm604_vm1, %v582_v60, %v607_v62  ;;  %v613_v3 = vrot.slane %v610_v63, 4 }
 0x190   : > { %v1428_v4 = vsel %vm557_vm14, %v609_v2, %v613_v3 }
 0x191   : > { %616 = vst [vmem:[#allocation2 + $0x4] sm:$0xff] %v1428_v4 }
 0x198   : > { %v617_v5 = vld [vmem:[#allocation2] sm:$0xff]  ;;  %v618_v6 = vld [vmem:[#allocation2 + $0x8] sm:$0xf] }
 0x199   : > { %621 = vst [vmem:[#allocation1] ss:$2 sm:$0xff] %v617_v5  ;;  %v642_v7 = vld [vmem:[#allocation2 + $0x8] sm:$0xf] }
 0x19a   : > { %623 = vst [vmem:[#allocation1 + $0x10] ss:$2 sm:$0xff] %v618_v6  ;;  %v665_v11 = vld [vmem:[#allocation2 + $0x8] sm:$0xf] }
 0x19b   : > { %v689_v15 = vld [vmem:[#allocation2 + $0x8] sm:$0xf] }
 0x1a0   : > { %v1431_v8 = vld.sshfl [vmem:[#allocation1] sm:$0xff pattern:$0x75316420]  ;;  %v625_v9 = vld.sshfl [vmem:[#allocation1 + $0x8] sm:$0xff pattern:$0x75316420] }
 0x1a1   : > { %646 = vst [vmem:[#allocation1 + $0x1] ss:$2 sm:$0xff] %v617_v5  ;;  %v626_v10 = vld.sshfl [vmem:[#allocation1 + $0x10] sm:$0xff pattern:$0x75316420]  ;;  %629 = vrot.lane.b32.xlu1 %v625_v9, %s1169_s18 }
 0x1a2   : > { %631 = vrot.lane.b32.xlu2 %v626_v10, %s1169_s18  ;;  %648 = vst [vmem:[#allocation1 + $0x11] ss:$2 sm:$0xff] %v642_v7 }
 0x1a8   : > { %v1435_v12 = vld.sshfl [vmem:[#allocation1] sm:$0xff pattern:$0x75316420]  ;;  %v650_v13 = vld.sshfl [vmem:[#allocation1 + $0x8] sm:$0xff pattern:$0x75316420] }
 0x1a9   : > { %668 = vst [vmem:[#allocation1] ss:$2 sm:$0xff] %v617_v5  ;;  %v651_v14 = vld.sshfl [vmem:[#allocation1 + $0x10] sm:$0xff pattern:$0x75316420] }
 0x1aa   : > { %670 = vst [vmem:[#allocation1 + $0x10] ss:$2 sm:$0xff] %v665_v11 }
 0x1b0   : > { %v671_v16 = vld.sshfl [vmem:[#allocation1] sm:$0xff pattern:$0x75316420]  ;;  %v672_v17 = vld.sshfl [vmem:[#allocation1 + $0x8] sm:$0xff pattern:$0x75316420] }
 0x1b1   : > { %692 = vst [vmem:[#allocation1] ss:$2 sm:$0xff] %v617_v5  ;;  %v673_v18 = vld.sshfl [vmem:[#allocation1 + $0x10] sm:$0xff pattern:$0x75316420]  ;;  %676 = vrot.lane.b32.xlu1 %v672_v17, %s1171_s20  ;;  %674 = vrot.lane.b32.xlu0 %v671_v16, %s1171_s20 }
 0x1b2   : > { %678 = vrot.lane.b32.xlu2 %v673_v18, %s1171_s20  ;;  %694 = vst [vmem:[#allocation1 + $0x10] ss:$2 sm:$0xff] %v689_v15 }
 0x1b8   : > { %v695_v20 = vld.sshfl [vmem:[#allocation1] sm:$0xff pattern:$0x75316420]  ;;  %v696_v21 = vld.sshfl [vmem:[#allocation1 + $0x8] sm:$0xff pattern:$0x75316420] }
 0x1b9   : > { %720 = vst [vmem:[#allocation1] ss:$2 sm:$0xff] %v1428_v4  ;;  %v697_v22 = vld.sshfl [vmem:[#allocation1 + $0x10] sm:$0xff pattern:$0x75316420] }
 0x1ba   : > { %702 = vrot.lane.b32.xlu0 %v697_v22, %s1172_s21  ;;  %700 = vrot.lane.b32.xlu2 %v696_v21, %s1172_s21  ;;  %733 = vst [vmem:[#allocation1 + $0x10] ss:$2 sm:$0xff] %v728_v19 }
 0x1c0   : > { %v721_v24 = vld.sshfl [vmem:[#allocation1] sm:$0xff pattern:$0x75316420]  ;;  %v722_v25 = vld.sshfl [vmem:[#allocation1 + $0x8] sm:$0xff pattern:$0x75316420] }
 0x1c1   : > { %731 = vst [vmem:[#allocation1] ss:$2 sm:$0xff] %v1428_v4  ;;  %v736_v26 = vld.sshfl [vmem:[#allocation1 + $0x10] sm:$0xff pattern:$0x75316420] }
 0x1c2   : > { %725 = vst [vmem:[#allocation3 + $0x48] sm:$0xf] %v721_v24  ;;  %741 = vrot.lane.b32.xlu2 %v736_v26, %s1174_s27  ;;  %698 = vrot.lane.b32.xlu0 %v695_v20, %s1172_s21  ;;  %s1011_s21 = sshll.u32 %s1237_s3, 3  ;;  %s902_s3 = scalar_lea.sflag [#allocation7], %s1302_s12 }
 0x1c3   : > { %726 = vst [vmem:[#allocation3 + $0x28] sm:$0xf] %v722_v25 }
 0x1c4   : > { %763 = vst [vmem:[#allocation1 + $0x10] ss:$2 sm:$0xff] %v758_v23 }
 0x1c8   : > { %v734_v27 = vld.sshfl [vmem:[#allocation1] sm:$0xff pattern:$0x75316420]  ;;  %v735_v28 = vld.sshfl [vmem:[#allocation1 + $0x8] sm:$0xff pattern:$0x75316420] }
 0x1c9   : > { %739 = vrot.lane.b32.xlu1 %v735_v28, %s1174_s27  ;;  %761 = vst [vmem:[#allocation1] ss:$2 sm:$0xff] %v1428_v4 }
 0x1cb   : > { %v766_v30 = vld.sshfl [vmem:[#allocation1 + $0x10] sm:$0xff pattern:$0x75316420] }
 0x1cc   : > { %788 = vst [vmem:[#allocation1 + $0x11] ss:$2 sm:$0xff] %v782_v29 }
 0x1d0   : > { %v765_v31 = vld.sshfl [vmem:[#allocation1 + $0x8] sm:$0xff pattern:$0x75316420]  ;;  %v764_v32 = vld.sshfl [vmem:[#allocation1] sm:$0xff pattern:$0x75316420] }
 0x1d1   : > { %771 = vrot.lane.b32.xlu1 %v766_v30, %s1173_s22  ;;  %769 = vrot.lane.b32.xlu0 %v765_v31, %s1173_s22  ;;  %786 = vst [vmem:[#allocation1 + $0x1] ss:$2 sm:$0xff] %v1428_v4 }
 0x1d2   : > { %767 = vrot.lane.b32.xlu2 %v764_v32, %s1173_s22 }
 0x1d3   : > { %v791_v34 = vld.sshfl [vmem:[#allocation1 + $0x10] sm:$0xff pattern:$0x75316420] }
 0x1d4   : > { %810 = vst [vmem:[#allocation1 + $0x10] ss:$2 sm:$0xff] %v805_v33 }
 0x1d8   : > { %v790_v35 = vld.sshfl [vmem:[#allocation1 + $0x8] sm:$0xff pattern:$0x75316420]  ;;  %v789_v36 = vld.sshfl [vmem:[#allocation1] sm:$0xff pattern:$0x75316420] }
 0x1d9   : > { %737 = vrot.lane.b32.xlu1 %v734_v27, %s1174_s27  ;;  %794 = vrot.lane.b32.xlu0 %v790_v35, %s1176_s30  ;;  %808 = vst [vmem:[#allocation1] ss:$2 sm:$0xff] %v1428_v4 }
 0x1db   : > { %v813_v37 = vld.sshfl [vmem:[#allocation1 + $0x10] sm:$0xff pattern:$0x75316420] }
 0x1dc   : > { %818 = vrot.lane.b32.xlu2 %v813_v37, %s1175_s29 }
 0x1e0   : > { %v811_v38 = vld.sshfl [vmem:[#allocation1] sm:$0xff pattern:$0x75316420]  ;;  %v812_v40 = vld.sshfl [vmem:[#allocation1 + $0x8] sm:$0xff pattern:$0x75316420] }
 0x1e1   : > { %796 = vrot.lane.b32.xlu1 %v791_v34, %s1176_s30  ;;  %792 = vrot.lane.b32.xlu0 %v789_v36, %s1176_s30  ;;  %s270_s30 = scalar_lea.vmem [#allocation8], %s995_s16  ;;  %s1120_s16 = scalar_lea.hbm %s1559_s6, 16 }
 0x1e2   : > { %s915_s13 = sshll.u32 %s270_s30, 4  ;;  %s916_s13 = int_to_ptr.vmem [resolvable:$true] %s915_s13 }
 0x1e4   : > { %814 = vrot.lane.b32.xlu2 %v811_v38, %s1175_s29 }
 0x1e9   : > { %627 = vrot.lane.b32.xlu0 %v1431_v8, %s1169_s18  ;;  %816 = vrot.lane.b32.xlu1 %v812_v40, %s1175_s29  ;;  %s913_s29 = scalar_lea.hbm %s1559_s6, %s1011_s21 }
 0x1ea   : > { %s917_s8 = sshll.u32 %s913_s29, 4  ;;  %s918_s8 = int_to_ptr.hbm [resolvable:$true] %s917_s8 }
 0x1eb   : > { %s1114_s14 = sshra.s32 %s918_s8, 4  ;;  %s1115_s14 = int_to_ptr.hbm [resolvable:$true] %s1114_s14 }
 0x1ec   : > { %656 = vrot.lane.b32.xlu2 %v651_v14, %s1170_s9  ;;  %s1116_s15 = scalar_lea.hbm %s1115_s14, 8  ;;  %p1121_p0 = scmp.lt.s32.totalorder %s1115_s14, %s1559_s6 }
 0x1ed   : > { %p1117_p6 = scmp.ne.s32.totalorder %s1115_s14, %s1116_s15  ;;  %p1122_p1 = scmp.lt.s32.totalorder %s1120_s16, %s1116_s15 }
 0x1ef   : > { %p1118_p9 = pnand %p1117_p6, %p1266_p11  ;;  %p1123_p3 = por %p1122_p1, %p1121_p0 }
 0x1f1   : > { %654 = vrot.lane.b32.xlu1 %v650_v13, %s1170_s9  ;;  %p1119_p13 = pneg %p1118_p9 }
 0x1f3   : > { %p1124_p4 = pnand %p1123_p3, %p1119_p13 }
 0x1f4   : > { %842 = vperm.xlu2 %1069, %v839_v43  }
 0x1f9   : > { %652 = vrot.lane.b32.xlu1 %v1435_v12, %s1170_s9 }
 0x1fc   : > { %v632_v41 = vpop.permute.xlu2 %631 }
 0x20c   : > { %v679_v39 = vpop.permute.xlu2 %678 }
 0x213   : > { %v630_v44 = vpop.permute.xlu1 %629 }
 0x214   : > { %v634_v45 = vsel %vm329_vm2, %v630_v44, %v632_v41  ;;  %v701_v42 = vpop.permute.xlu2 %700 }
 0x215   : > { %v638_v46 = vsel %vm1357_vm3, %v634_v45, 0.0 }
 0x216   : > { %640 = vst [vmem:[#allocation3] sm:$0xf] %v638_v46  ;;  %v828_v46 = vld [vmem:[%s1557_s4] sm:$0xf] }
 0x21c   : > { %v742_v63 = vpop.permute.xlu2 %741 }
 0x223   : > { %v677_v47 = vpop.permute.xlu1 %676  ;;  %v675_v48 = vpop.permute.xlu0 %674 }
 0x224   : > { %v681_v50 = vsel %vm382_vm4, %v677_v47, %v679_v39  ;;  %v680_v52 = vsel %vm382_vm4, %v675_v48, %v677_v47 }
 0x225   : > { %v685_v53 = vsel %vm1369_vm6, %v681_v50, 0.0  ;;  %v684_v54 = vsel %vm1365_vm5, %v680_v52, 0.0 }
 0x226   : > { %687 = vst [vmem:[#allocation3 + $0x10] sm:$0xf] %v685_v53 }
 0x227   : > { %686 = vst [vmem:[#allocation3 + $0x18] sm:$0xf] %v684_v54 }
 0x22c   : > { %v703_v55 = vpop.permute.xlu0 %702  ;;  %v768_v6 = vpop.permute.xlu2 %767 }
 0x22d   : > { %v705_v56 = vsel %vm407_vm7, %v701_v42, %v703_v55 }
 0x22e   : > { %v709_v57 = vsel %vm1357_vm3, %v705_v56, 0.0 }
 0x22f   : > { %v713_v58 = vrot.slane %v709_v57, 4 }
 0x231   : > { %717 = vst [vmem:[#allocation3 + $0x10] sm:$0xf0] %v713_v58 }
 0x234   : > { %v699_v59 = vpop.permute.xlu0 %698 }
 0x235   : > { %v704_v60 = vsel %vm407_vm7, %v699_v59, %v701_v42 }
 0x236   : > { %v708_v61 = vsel %vm1382_vm8, %v704_v60, 0.0  ;;  %v819_v18 = vpop.permute.xlu2 %818 }
 0x237   : > { %v712_v62 = vrot.slane %v708_v61, 4 }
 0x239   : > { %716 = vst [vmem:[#allocation3 + $0x18] sm:$0xf0] %v712_v62 }
 0x23b   : > { %v740_v2 = vpop.permute.xlu1 %739 }
 0x23c   : > { %v744_v3 = vsel %vm447_vm10, %v740_v2, %v742_v63 }
 0x23d   : > { %v748_v4 = vsel %vm1369_vm6, %v744_v3, 0.0 }
 0x23e   : > { %v752_v5 = vrot.slane %v748_v4, 4  ;;  %v815_v23 = vpop.permute.xlu2 %814 }
 0x240   : > { %756 = vst [vmem:[#allocation3 + $0x28] sm:$0xf0] %v752_v5  ;;  %v831_v41 = vld [vmem:[#allocation3 + $0x18] sm:$0xff] }
 0x243   : > { %v772_v7 = vpop.permute.xlu1 %771  ;;  %v770_v8 = vpop.permute.xlu0 %769 }
 0x244   : > { %v773_v9 = vsel %vm478_vm9, %v768_v6, %v770_v8  ;;  %v774_v10 = vsel %vm478_vm9, %v770_v8, %v772_v7 }
 0x245   : > { %v777_v11 = vsel %vm1382_vm8, %v773_v9, 0.0  ;;  %v778_v12 = vsel %vm1357_vm3, %v774_v10, 0.0 }
 0x246   : > { %779 = vst [vmem:[#allocation3 + $0x8] sm:$0xf] %v777_v11  ;;  %v657_v32 = vpop.permute.xlu2 %656 }
 0x247   : > { %780 = vst [vmem:[#allocation3 + $0x20] sm:$0xf] %v778_v12  ;;  %v834_v37 = vld [vmem:[#allocation3 + $0x28] sm:$0xff] }
 0x24b   : > { %v738_v13 = vpop.permute.xlu1 %737  ;;  %v795_v14 = vpop.permute.xlu0 %794 }
 0x24c   : > { %v743_v15 = vsel %vm447_vm10, %v738_v13, %v740_v2 }
 0x24d   : > { %v747_v16 = vsel %vm1365_vm5, %v743_v15, 0.0 }
 0x24e   : > { %v751_v17 = vrot.slane %v747_v16, 4  ;;  %v843_v47 = vpop.permute.xlu2 %842 }
 0x250   : > { %755 = vst [vmem:[#allocation3 + $0x48] sm:$0xf0] %v751_v17 }
 0x253   : > { %v797_v19 = vpop.permute.xlu1 %796  ;;  %v793_v20 = vpop.permute.xlu0 %792 }
 0x254   : > { %v799_v21 = vsel %vm504_vm12, %v795_v14, %v797_v19  ;;  %v798_v22 = vsel %vm504_vm12, %v793_v20, %v795_v14 }
 0x255   : > { %803 = vst [vmem:[#allocation3 + $0x20] sm:$0xf0] %v799_v21 }
 0x256   : > { %802 = vst [vmem:[#allocation3 + $0x8] sm:$0xf0] %v798_v22 }
 0x257   : > { %v833_v51 = vld [vmem:[#allocation3 + $0x48] sm:$0xff] }
 0x25b   : > { %v628_v24 = vpop.permute.xlu0 %627  ;;  %v817_v25 = vpop.permute.xlu1 %816 }
 0x25c   : > { %v633_v26 = vsel %vm329_vm2, %v628_v24, %v630_v44  ;;  %v820_v27 = vsel %vm527_vm13, %v815_v23, %v817_v25  ;;  %v821_v28 = vsel %vm527_vm13, %v817_v25, %v819_v18  ;;  %v836_v49 = vld [vmem:[#allocation3 + $0x20] sm:$0xff]  ;;  %v832_v44 = vld [vmem:[#allocation3 + $0x10] sm:$0xff] }
 0x25d   : > { %v637_v29 = vsel %vm1382_vm8, %v633_v26, 0.0  ;;  %v824_v30 = vsel %vm1365_vm5, %v820_v27, 0.0  ;;  %v825_v31 = vsel %vm1369_vm6, %v821_v28, 0.0  ;;  %v835_v0 = vld [vmem:[#allocation3 + $0x8] sm:$0xff] }
 0x25e   : > { %639 = vst [vmem:[#allocation3 + $0x30] sm:$0xf] %v637_v29 }
 0x25f   : > { %826 = vst [vmem:[#allocation3 + $0x40] sm:$0xf] %v824_v30 }
 0x260   : > { %827 = vst [vmem:[#allocation3 + $0x38] sm:$0xf] %v825_v31 }
 0x263   : > { %v655_v33 = vpop.permute.xlu1 %654 }
 0x264   : > { %v659_v34 = vsel %vm355_vm11, %v655_v33, %v657_v32 }
 0x265   : > { %663 = vst [vmem:[#allocation3] sm:$0xf0] %v659_v34 }
 0x266   : > { %v837_v35 = vld [vmem:[#allocation3 + $0x40] sm:$0xf] }
 0x267   : > { %1001 = vmatpush.msk.msra.mxu2 %vm557_vm14, %v837_v35  ;;  %v838_v36 = vld [vmem:[#allocation3 + $0x38] sm:$0xf] }
 0x268   : > { %1003 = vmatpush.msk.msra.mxu3 %vm557_vm14, %v838_v36 }
 0x269   : > { %866 = vmatpush.msra.mxu2 %v835_v0 }
 0x26a   : > { %886 = vmatpush.msra.mxu3 %v836_v49 }
 0x26b   : > { %867 = vmatpush.msra.mxu2 %v833_v51  ;;  %v653_v38 = vpop.permute.xlu1 %652 }
 0x26c   : > { %887 = vmatpush.msra.mxu3 %v834_v37  ;;  %v658_v40 = vsel %vm355_vm11, %v653_v38, %v655_v33  ;;  %v830_v45 = vld [vmem:[#allocation3] sm:$0xff] }
 0x26d   : > { %662 = vst [vmem:[#allocation3 + $0x30] sm:$0xf0] %v658_v40  ;;  %868 = vmatpush.msra.mxu2 %v831_v41 }
 0x26e   : > { %888 = vmatpush.msra.mxu3 %v832_v44 }
 0x270   : > { %889 = vmatpush.msra.mxu3 %v830_v45 }
 0x271   : > { %1004 = vmatmul.msk.f32.vlgmr.msra.gmra.mxu3 %vm553_vm15, %v828_v46 }
 0x274   : > { %v829_v39 = vld [vmem:[#allocation3 + $0x30] sm:$0xff] }
 0x275   : > { %869 = vmatpush.msra.mxu2 %v829_v39 }
 0x276   : > { %1002 = vmatmul.msk.f32.vlgmr.msra.gmra.mxu2 %vm553_vm15, %v828_v46 }
 0x2f4   : > { %v891_v48 = vpop.f32.mrf.mxu3 }
 0x2f5   : > { %v892_v50 = vadd.f32 %v891_v48, %v843_v47 }
 0x2f7   : > { %v896_v52 = vrot.slane %v892_v50, 4 }
 0x2f9   : > { %v871_v53 = vpop.f32.mrf.mxu2 }
 0x2fa   : > { %v872_v54 = vadd.f32 %v871_v53, %v843_v47 }
 0x2fc   : > { %v897_v42 = vsel %vm557_vm14, %v872_v54, %v896_v52 }
 0x2fd   : > { %v899_v55 = vadd.f32 %v897_v42, %v1312_v1 }
 0x2ff   : > { %900 = vst [vmem:[%s270_s30] sm:$0xff] %v899_v55 }
 0x300   : > { %1127 = shalt.err (!%p1124_p4)
}
 0x301   : > { %1014 = dma.vmem_to_hbm [thread:$0]  (%p1266_p11), %s916_s13, 128, %s918_s8, %s902_s3  }
 0x302 PF: > { %s929_s12 = sand.u32 1, %s1154_s23   ;;  %p1573_p7 = scmp.ge.s32.totalorder %s1166_s26, 2 }
 0x303   : > { %s930_s20 = scalar_lea.sflag [#allocation7], %s929_s12 }
 0x304   : > { %p1021_p5 = pnand %p1573_p7, %p1270_p12 }
 0x306   : > { %p1022_p8 = pneg %p1021_p5 }
 0x308   : > { %1149 = dma.done.wait (%p1022_p8), %s930_s20, 128  }
 0x309   : > { %1151 = vsyncadd (%p1022_p8), %s930_s20, 4294967168  ;;  %p20_p10 = scmp.ge.s32.totalorder %s1241_s28, 4   ;;  %s1574_s23 = smov %s1158_s24 }
 0x30a   : > { %s1575_s24 = smov %s1162_s25  ;;  %s1576_s25 = smov %s1253_s7 }
 0x30b   : > { %s1577_s26 = smov %s1241_s28  ;;  %22 = sbr.rel (!%p20_p10) target bundleno = 7 (0x7), region = 109 }
 0x310   :  { %936 = vsyncpa [#allocation6], 1 }
 0x311   :  { %938 = vsyncpa [#allocation6 + $0x1], 1 }
 0x312   :  { %939 = vsyncpa [#allocation7], 1 }
 0x313   :  { %941 = vsyncpa [#allocation7 + $0x1], 1 }

</bundles_post_ra>
